<compile_context>
chip_gen: v7x
topology: tpu7x:2x2x1
jax: 0.10.0
libtpu: 0.0.40
codegen_flags: <defaults>
</compile_context>

<pallas_src>
import functools

import jax
import jax.numpy as jnp
from jax.experimental import pallas as pl
from jax.experimental.pallas import tpu as pltpu

BN_EPS = 1e-5
LANES = 128
DEFAULT_TILE_B = 2048
VMEM_LIMIT_BYTES = 32 * 1024 * 1024   # << actual footprint; safe on v5e/v6e/v7x


def _round_up(x, m):
    return (x + m - 1) // m * m


def _stats_kernel(h_ref, w1_ref, b1_ref, sum_ref, sq_ref,
                  *, tile_b, tiles_per_split, b_true):
    """Pass 1: per-split sum / sum-of-squares of ReLU(h @ W1 + b1).

    h_ref:   (tile_b, in_feats) bf16
    w1_ref:  (in_feats, hidden_pad) bf16
    b1_ref:  (1, hidden_pad) f32
    sum_ref/sq_ref: (1, hidden_pad) f32 output blocks, resident across the
                    inner ('arbitrary') grid axis for a fixed split index.
    """
    c = pl.program_id(0)   # split (TensorCore shard)
    t = pl.program_id(1)   # batch tile within split

    @pl.when(t == 0)
    def _():
        sum_ref[...] = jnp.zeros_like(sum_ref)
        sq_ref[...] = jnp.zeros_like(sq_ref)

    # Linear1 (bf16 operands, f32 accumulation on the MXU) + bias + ReLU.
    z = jnp.dot(h_ref[...], w1_ref[...],
                preferred_element_type=jnp.float32) + b1_ref[...]
    a = jnp.maximum(z, 0.0)

    tile_start = (c * tiles_per_split + t) * tile_b
    in_bounds = tile_start + tile_b <= b_true

    # Full tiles: accumulate unmasked (no VPU masking cost).
    @pl.when(in_bounds)
    def _():
        sum_ref[...] += jnp.sum(a, axis=0, keepdims=True)
        sq_ref[...] += jnp.sum(a * a, axis=0, keepdims=True)

    # Tiles containing batch padding: mask padded rows so they never pollute
    # the statistics (padded rows would otherwise contribute relu(b1)).
    @pl.when(jnp.logical_not(in_bounds))
    def _():
        row = tile_start + jax.lax.broadcasted_iota(jnp.int32, (tile_b, 1), 0)
        am = jnp.where(row < b_true, a, 0.0)
        sum_ref[...] += jnp.sum(am, axis=0, keepdims=True)
        sq_ref[...] += jnp.sum(am * am, axis=0, keepdims=True)


def _apply_kernel(h_ref, w1_ref, b1_ref, w2_ref, b2_ref, out_ref):
    """Pass 2: recompute Linear1+ReLU, apply BN-folded lane-padded Linear2."""
    z = jnp.dot(h_ref[...], w1_ref[...],
                preferred_element_type=jnp.float32) + b1_ref[...]
    a = jnp.maximum(z, 0.0)
    out = jnp.dot(a.astype(jnp.bfloat16), w2_ref[...],
                  preferred_element_type=jnp.float32) + b2_ref[...]
    out_ref[...] = out.astype(out_ref.dtype)          # bf16 writeback


def mlp_regressor(h, w1, b1, gamma, beta, w2, b2, *, tile_b=None):
    """Forward pass.

    h:     (B, in_feats) float32
    w1:    (hidden, in_feats)   -- PyTorch nn.Linear layout (out, in)
    b1:    (hidden,)
    gamma: (hidden,)            -- BatchNorm1d weight
    beta:  (hidden,)            -- BatchNorm1d bias
    w2:    (n_tasks, hidden)
    b2:    (n_tasks,)
    returns (B, n_tasks) float32
    """
    B, in_feats = h.shape
    hidden = w1.shape[0]
    n_tasks = w2.shape[0]

    if tile_b is None:
        tile_b = min(DEFAULT_TILE_B, _round_up(B, 8))

    num_tiles = pl.cdiv(B, tile_b)
    n_splits = 2 if num_tiles >= 2 else 1            # v7x dual-TC sharding
    tiles_per_split = pl.cdiv(num_tiles, n_splits)
    total_tiles = n_splits * tiles_per_split
    b_pad = total_tiles * tile_b

    hidden_pad = _round_up(hidden, LANES)             # lane-dense hidden dim
    n_pad = _round_up(max(n_tasks, LANES), LANES)     # lane-dense output dim

    # ---- Layout / dtype plumbing (outside the kernels) -----------------------
    #  * weights transposed to (in, out) so the hot path is plain x @ W
    #  * matmul operands cast to bf16 (f32 accumulation inside the kernels)
    #  * hidden and output dims zero-padded to 128-lane multiples
    #  * batch zero-padded to a multiple of tile_b (masked in the stats pass)
    h_p = jnp.pad(h, ((0, b_pad - B), (0, 0))).astype(jnp.bfloat16)
    w1_t = jnp.pad(w1.T, ((0, 0), (0, hidden_pad - hidden))).astype(jnp.bfloat16)
    b1_r = jnp.pad(b1.reshape(1, hidden),
                   ((0, 0), (0, hidden_pad - hidden))).astype(jnp.float32)
    gamma_p = jnp.pad(gamma, (0, hidden_pad - hidden)).astype(jnp.float32)
    beta_p = jnp.pad(beta, (0, hidden_pad - hidden)).astype(jnp.float32)
    w2_t = jnp.pad(w2.T, ((0, hidden_pad - hidden),
                          (0, n_pad - n_tasks))).astype(jnp.float32)
    b2_r = jnp.pad(b2.reshape(1, n_tasks),
                   ((0, 0), (0, n_pad - n_tasks))).astype(jnp.float32)

    def full2(shape):   # full-extent block, resident across the 2-D grid
        return pl.BlockSpec(shape, lambda c, t: (0, 0))

    def full1(shape):   # full-extent block, resident across the 1-D grid
        return pl.BlockSpec(shape, lambda t: (0, 0))

    # ---- Pass 1: per-split batch statistics ---------------------------------
    sums, sqs = pl.pallas_call(
        functools.partial(_stats_kernel, tile_b=tile_b,
                          tiles_per_split=tiles_per_split, b_true=B),
        out_shape=(jax.ShapeDtypeStruct((n_splits, hidden_pad), jnp.float32),
                   jax.ShapeDtypeStruct((n_splits, hidden_pad), jnp.float32)),
        grid_spec=pltpu.PrefetchScalarGridSpec(
            num_scalar_prefetch=0,
            grid=(n_splits, tiles_per_split),
            in_specs=[pl.BlockSpec((tile_b, in_feats),
                                   lambda c, t: (c * tiles_per_split + t, 0)),
                      full2((in_feats, hidden_pad)),
                      full2((1, hidden_pad))],
            out_specs=(pl.BlockSpec((1, hidden_pad), lambda c, t: (c, 0)),
                       pl.BlockSpec((1, hidden_pad), lambda c, t: (c, 0)))),
        compiler_params=pltpu.CompilerParams(
            dimension_semantics=("parallel", "arbitrary"),
            vmem_limit_bytes=VMEM_LIMIT_BYTES),
    )(h_p, w1_t, b1_r)

    # ---- Wrapper: combine splits, finalize BN, fold into Linear2 -------------
    mean = jnp.sum(sums, axis=0, keepdims=True) / B          # biased train-mode
    ex2 = jnp.sum(sqs, axis=0, keepdims=True) / B
    var = jnp.maximum(ex2 - mean * mean, 0.0)
    rstd = jax.lax.rsqrt(var + BN_EPS)
    scale = gamma_p.reshape(1, hidden_pad) * rstd             # (1, hidden_pad)
    shift = beta_p.reshape(1, hidden_pad) - mean * scale
    w2_fold = (scale.reshape(hidden_pad, 1) * w2_t).astype(jnp.bfloat16)
    b2_fold = (shift @ w2_t + b2_r).astype(jnp.float32)       # (1, n_pad)

    # ---- Pass 2: Linear1 + ReLU + folded Linear2 (independent batch tiles) ---
    out_padded = pl.pallas_call(
        _apply_kernel,
        out_shape=jax.ShapeDtypeStruct((b_pad, n_pad), jnp.bfloat16),
        grid_spec=pltpu.PrefetchScalarGridSpec(
            num_scalar_prefetch=0,
            grid=(total_tiles,),
            in_specs=[pl.BlockSpec((tile_b, in_feats), lambda t: (t, 0)),
                      full1((in_feats, hidden_pad)),
                      full1((1, hidden_pad)),
                      full1((hidden_pad, n_pad)),
                      full1((1, n_pad))],
            out_specs=pl.BlockSpec((tile_b, n_pad), lambda t: (t, 0))),
        compiler_params=pltpu.CompilerParams(
            dimension_semantics=("parallel",),      # megacore / v7x dual-TC
            vmem_limit_bytes=VMEM_LIMIT_BYTES),
    )(h_p, w1_t, b1_r, w2_fold, b2_fold)

    return out_padded[:B, :n_tasks].astype(jnp.float32)


def reference_forward(h, w1, b1, gamma, beta, w2, b2):
    z = h @ w1.T + b1
    a = jnp.maximum(z, 0.0)
    mean = jnp.mean(a, axis=0, keepdims=True)
    var = jnp.mean((a - mean) ** 2, axis=0, keepdims=True)
    bn = (a - mean) / jnp.sqrt(var + BN_EPS) * gamma + beta
    return bn @ w2.T + b2


if __name__ == "__main__":
    B, in_feats, hidden_feats, n_tasks = 8, 32, 64, 4

    key = jax.random.PRNGKey(0)
    k_h, k_w1, k_b1, k_g, k_bt, k_w2, k_b2 = jax.random.split(key, 7)

    h = jax.random.normal(k_h, (B, in_feats), dtype=jnp.float32)

    # PyTorch-layout parameters: nn.Linear weight is (out, in).
    w1 = jax.random.normal(k_w1, (hidden_feats, in_feats), jnp.float32) / jnp.sqrt(in_feats)
    b1 = 0.1 * jax.random.normal(k_b1, (hidden_feats,), jnp.float32)
    gamma = 1.0 + 0.1 * jax.random.normal(k_g, (hidden_feats,), jnp.float32)
    beta = 0.1 * jax.random.normal(k_bt, (hidden_feats,), jnp.float32)
    w2 = jax.random.normal(k_w2, (n_tasks, hidden_feats), jnp.float32) / jnp.sqrt(hidden_feats)
    b2 = 0.1 * jax.random.normal(k_b2, (n_tasks,), jnp.float32)

    out = mlp_regressor(h, w1, b1, gamma, beta, w2, b2)
    out = jax.block_until_ready(out)

    ref = reference_forward(h, w1, b1, gamma, beta, w2, b2)
    assert out.shape == (B, n_tasks)
    max_err = float(jnp.max(jnp.abs(out - ref)))
    assert jnp.allclose(out, ref, atol=5e-2, rtol=5e-2), (
        f"mismatch vs JAX reference (max abs err {max_err})")

    print("KERNEL_OK")
</pallas_src>

<mosaic_0001>
module attributes {stable_mosaic.version = 11 : i64} {
  func.func @_stats_kernel(%arg0: i32, %arg1: i32, %arg2: memref<8x32xbf16, #tpu.memory_space<vmem>>, %arg3: memref<32x128xbf16, #tpu.memory_space<vmem>>, %arg4: memref<1x128xf32, #tpu.memory_space<vmem>>, %arg5: memref<1x128xf32, #tpu.memory_space<vmem>>, %arg6: memref<1x128xf32, #tpu.memory_space<vmem>>) attributes {dimension_semantics = [#tpu.dimension_semantics<parallel>, #tpu.dimension_semantics<arbitrary>], iteration_bounds = array<i64: 1, 1>, scalar_prefetch = 0 : i64, scratch_operands = 0 : i64, tpu.core_type = #tpu.core_type<tc>, window_params = [{transform_indices = @transform_0, window_bounds = array<i64: 8, 32>}, {pipeline_mode = #tpu.pipeline_mode<synchronous>, transform_indices = @transform_1, window_bounds = array<i64: 32, 128>}, {pipeline_mode = #tpu.pipeline_mode<synchronous>, transform_indices = @transform_2, window_bounds = array<i64: 1, 128>}, {transform_indices = @transform_3, window_bounds = array<i64: 1, 128>}, {transform_indices = @transform_4, window_bounds = array<i64: 1, 128>}]} {
    %c0_i32 = arith.constant 0 : i32
    %0 = arith.cmpi eq, %arg1, %c0_i32 : i32
    %1 = arith.extui %0 : i1 to i32
    %c0_i32_0 = arith.constant 0 : i32
    %2 = arith.cmpi ne, %1, %c0_i32_0 : i32
    scf.if %2 {
      %cst_11 = arith.constant 0.000000e+00 : f32
      %21 = vector.broadcast %cst_11 : f32 to vector<1x128xf32>
      %c0_12 = arith.constant 0 : index
      %c0_13 = arith.constant 0 : index
      %22 = vector.load %arg5[%c0_12, %c0_13] : memref<1x128xf32, #tpu.memory_space<vmem>>, vector<1x128xf32>
      tpu.vector_store %arg5[%c0_12, %c0_13], %21 {strides = array<i32>} : memref<1x128xf32, #tpu.memory_space<vmem>>, vector<1x128xf32>,
      %cst_14 = arith.constant 0.000000e+00 : f32
      %23 = vector.broadcast %cst_14 : f32 to vector<1x128xf32>
      %c0_15 = arith.constant 0 : index
      %c0_16 = arith.constant 0 : index
      %24 = vector.load %arg6[%c0_15, %c0_16] : memref<1x128xf32, #tpu.memory_space<vmem>>, vector<1x128xf32>
      tpu.vector_store %arg6[%c0_15, %c0_16], %23 {strides = array<i32>} : memref<1x128xf32, #tpu.memory_space<vmem>>, vector<1x128xf32>,
    } else {
    }
    %c0 = arith.constant 0 : index
    %c0_1 = arith.constant 0 : index
    %3 = vector.load %arg2[%c0, %c0_1] : memref<8x32xbf16, #tpu.memory_space<vmem>>, vector<8x32xbf16>
    %c0_2 = arith.constant 0 : index
    %c0_3 = arith.constant 0 : index
    %4 = vector.load %arg3[%c0_2, %c0_3] : memref<32x128xbf16, #tpu.memory_space<vmem>>, vector<32x128xbf16>
    %cst = arith.constant dense<0.000000e+00> : vector<8x128xf32>
    %5 = tpu.matmul %3, %4, %cst {dimension_numbers = #tpu.dot_dimension_numbers<[1], [0], [0], [1], [0, 0, 1, 1], [], []>} : vector<8x32xbf16>, vector<32x128xbf16>, vector<8x128xf32> -> vector<8x128xf32>
    %c0_4 = arith.constant 0 : index
    %c0_5 = arith.constant 0 : index
    %6 = vector.load %arg4[%c0_4, %c0_5] : memref<1x128xf32, #tpu.memory_space<vmem>>, vector<1x128xf32>
    %7 = vector.broadcast %6 : vector<1x128xf32> to vector<8x128xf32>
    %8 = arith.addf %5, %7 : vector<8x128xf32>
    %cst_6 = arith.constant 0.000000e+00 : f32
    %9 = vector.broadcast %cst_6 : f32 to vector<8x128xf32>
    %10 = arith.maximumf %8, %9 : vector<8x128xf32>
    %c1_i32 = arith.constant 1 : i32
    %11 = arith.muli %arg0, %c1_i32 : i32
    %12 = arith.addi %11, %arg1 : i32
    %c8_i32 = arith.constant 8 : i32
    %13 = arith.muli %12, %c8_i32 : i32
    %c8_i32_7 = arith.constant 8 : i32
    %14 = arith.addi %13, %c8_i32_7 : i32
    %c8_i32_8 = arith.constant 8 : i32
    %15 = arith.cmpi sle, %14, %c8_i32_8 : i32
    %16 = arith.extui %15 : i1 to i32
    %c0_i32_9 = arith.constant 0 : i32
    %17 = arith.cmpi ne, %16, %c0_i32_9 : i32
    scf.if %17 {
      %c0_11 = arith.constant 0 : index
      %c0_12 = arith.constant 0 : index
      %21 = vector.load %arg5[%c0_11, %c0_12] : memref<1x128xf32, #tpu.memory_space<vmem>>, vector<1x128xf32>
      %cst_13 = arith.constant dense<0.000000e+00> : vector<128xf32>
      %22 = vector.multi_reduction <add>, %10, %cst_13 [0] : vector<8x128xf32> to vector<128xf32>
      %23 = vector.shape_cast %22 : vector<128xf32> to vector<1x128xf32>
      %24 = arith.addf %21, %23 : vector<1x128xf32>
      %c0_14 = arith.constant 0 : index
      %c0_15 = arith.constant 0 : index
      %25 = vector.load %arg5[%c0_14, %c0_15] : memref<1x128xf32, #tpu.memory_space<vmem>>, vector<1x128xf32>
      tpu.vector_store %arg5[%c0_14, %c0_15], %24 {strides = array<i32>} : memref<1x128xf32, #tpu.memory_space<vmem>>, vector<1x128xf32>,
      %c0_16 = arith.constant 0 : index
      %c0_17 = arith.constant 0 : index
      %26 = vector.load %arg6[%c0_16, %c0_17] : memref<1x128xf32, #tpu.memory_space<vmem>>, vector<1x128xf32>
      %27 = arith.mulf %10, %10 : vector<8x128xf32>
      %cst_18 = arith.constant dense<0.000000e+00> : vector<128xf32>
      %28 = vector.multi_reduction <add>, %27, %cst_18 [0] : vector<8x128xf32> to vector<128xf32>
      %29 = vector.shape_cast %28 : vector<128xf32> to vector<1x128xf32>
      %30 = arith.addf %26, %29 : vector<1x128xf32>
      %c0_19 = arith.constant 0 : index
      %c0_20 = arith.constant 0 : index
      %31 = vector.load %arg6[%c0_19, %c0_20] : memref<1x128xf32, #tpu.memory_space<vmem>>, vector<1x128xf32>
      tpu.vector_store %arg6[%c0_19, %c0_20], %30 {strides = array<i32>} : memref<1x128xf32, #tpu.memory_space<vmem>>, vector<1x128xf32>,
    } else {
    }
    %true = arith.constant true
    %18 = arith.xori %15, %true : i1
    %19 = arith.extui %18 : i1 to i32
    %c0_i32_10 = arith.constant 0 : i32
    %20 = arith.cmpi ne, %19, %c0_i32_10 : i32
    scf.if %20 {
      %21 = tpu.iota {dimensions = array<i32: 0>} : vector<8x1xi32>
      %22 = vector.broadcast %13 : i32 to vector<8x1xi32>
      %23 = arith.addi %22, %21 : vector<8x1xi32>
      %c8_i32_11 = arith.constant 8 : i32
      %24 = vector.broadcast %c8_i32_11 : i32 to vector<8x1xi32>
      %25 = arith.cmpi slt, %23, %24 : vector<8x1xi32>
      %cst_12 = arith.constant 0.000000e+00 : f32
      %26 = vector.shape_cast %25 : vector<8x1xi1> to vector<8x1xi1>
      %27 = vector.broadcast %26 : vector<8x1xi1> to vector<8x128xi1>
      %28 = vector.broadcast %cst_12 : f32 to vector<8x128xf32>
      %29 = arith.select %27, %10, %28 : vector<8x128xi1>, vector<8x128xf32>
      %c0_13 = arith.constant 0 : index
      %c0_14 = arith.constant 0 : index
      %30 = vector.load %arg5[%c0_13, %c0_14] : memref<1x128xf32, #tpu.memory_space<vmem>>, vector<1x128xf32>
      %cst_15 = arith.constant dense<0.000000e+00> : vector<128xf32>
      %31 = vector.multi_reduction <add>, %29, %cst_15 [0] : vector<8x128xf32> to vector<128xf32>
      %32 = vector.shape_cast %31 : vector<128xf32> to vector<1x128xf32>
      %33 = arith.addf %30, %32 : vector<1x128xf32>
      %c0_16 = arith.constant 0 : index
      %c0_17 = arith.constant 0 : index
      %34 = vector.load %arg5[%c0_16, %c0_17] : memref<1x128xf32, #tpu.memory_space<vmem>>, vector<1x128xf32>
      tpu.vector_store %arg5[%c0_16, %c0_17], %33 {strides = array<i32>} : memref<1x128xf32, #tpu.memory_space<vmem>>, vector<1x128xf32>,
      %c0_18 = arith.constant 0 : index
      %c0_19 = arith.constant 0 : index
      %35 = vector.load %arg6[%c0_18, %c0_19] : memref<1x128xf32, #tpu.memory_space<vmem>>, vector<1x128xf32>
      %36 = arith.mulf %29, %29 : vector<8x128xf32>
      %cst_20 = arith.constant dense<0.000000e+00> : vector<128xf32>
      %37 = vector.multi_reduction <add>, %36, %cst_20 [0] : vector<8x128xf32> to vector<128xf32>
      %38 = vector.shape_cast %37 : vector<128xf32> to vector<1x128xf32>
      %39 = arith.addf %35, %38 : vector<1x128xf32>
      %c0_21 = arith.constant 0 : index
      %c0_22 = arith.constant 0 : index
      %40 = vector.load %arg6[%c0_21, %c0_22] : memref<1x128xf32, #tpu.memory_space<vmem>>, vector<1x128xf32>
      tpu.vector_store %arg6[%c0_21, %c0_22], %39 {strides = array<i32>} : memref<1x128xf32, #tpu.memory_space<vmem>>, vector<1x128xf32>,
    } else {
    }
    return
  }
  func.func @transform_0(%arg0: i32, %arg1: i32) -> (i32, i32) {
    %c1_i32 = arith.constant 1 : i32
    %0 = arith.muli %arg0, %c1_i32 : i32
    %1 = arith.addi %0, %arg1 : i32
    %c0_i32 = arith.constant 0 : i32
    %c0_i32_0 = arith.constant 0 : i32
    return %1, %c0_i32 : i32, i32
  }
  func.func @transform_1(%arg0: i32, %arg1: i32) -> (i32, i32) {
    %c0_i32 = arith.constant 0 : i32
    %c0_i32_0 = arith.constant 0 : i32
    %c0_i32_1 = arith.constant 0 : i32
    return %c0_i32, %c0_i32_0 : i32, i32
  }
  func.func @transform_2(%arg0: i32, %arg1: i32) -> (i32, i32) {
    %c0_i32 = arith.constant 0 : i32
    %c0_i32_0 = arith.constant 0 : i32
    %c0_i32_1 = arith.constant 0 : i32
    return %c0_i32, %c0_i32_0 : i32, i32
  }
  func.func @transform_3(%arg0: i32, %arg1: i32) -> (i32, i32) {
    %c0_i32 = arith.constant 0 : i32
    %c0_i32_0 = arith.constant 0 : i32
    return %arg0, %c0_i32 : i32, i32
  }
  func.func @transform_4(%arg0: i32, %arg1: i32) -> (i32, i32) {
    %c0_i32 = arith.constant 0 : i32
    %c0_i32_0 = arith.constant 0 : i32
    return %arg0, %c0_i32 : i32, i32
  }
}

</mosaic_0001>

<bundles_post_ra>
// kernel: tpu_custom_call.1
= control target key start
LH: loop header
LB: loop body
LE: loop exit
PB: predicated region body
PF: predicated region fallthrough
CT: control target
= control target key end

     0   :  { %10 = vsyncpa [#allocation3], 0  ;;  %s431_s0 = inlined_call_operand.hbm [shape: bf16[8,32], index: 0, kind: input, shape index: {}]   ;;  %s432_s1 = inlined_call_operand.hbm [shape: bf16[32,128], index: 1, kind: input, shape index: {}]   ;;  %s433_s2 = inlined_call_operand.vmem [shape: f32[1,128], index: 2, kind: input, shape index: {}]   ;;  %s434_s3 = inlined_call_operand.hbm [shape: f32[1,128], index: 3, kind: output, shape index: {0}]   ;;  %s435_s4 = inlined_call_operand.hbm [shape: f32[1,128], index: 4, kind: output, shape index: {1}]  }
   0x1   :  { %11 = vsyncpa [#allocation6], 0 }
   0x2   :  { %12 = vsyncpa [#allocation4], 0 }
   0x3   :  { %13 = vsyncpa [#allocation9], 0  ;;  %s332_s15 = smov [#allocation2]   ;;  %s333_s17 = smov [#allocation5]  }
   0x4   :  { %s23_s16 = sshll.u32 %s332_s15, 4  ;;  %s32_s18 = sshll.u32 %s333_s17, 4  ;;  %s24_s16 = int_to_ptr.vmem [resolvable:$true] %s23_s16  ;;  %s365_s18 = int_to_ptr.vmem [resolvable:$true] %s32_s18 }
   0x5   :  { %s236_s21 = scalar_lea.hbm %s431_s0, 64 }
   0x6   :  { %p237_p0 = scmp.ne.s32.totalorder %s431_s0, %s236_s21  ;;  %p240_p1 = scmp.lt.u32.totalorder %s236_s21, %s431_s0 }
   0x8   :  { %p242_p2 = pnand %p240_p1, %p237_p0 }
   0xa   :  { %245 = shalt.err (!%p242_p2)
}
   0xb   :  { %s246_s26 = scalar_lea.vmem %s24_s16, 64  ;;  %p251_p4 = scmp.lt.s32.totalorder %s24_s16, %s24_s16 }
   0xc   :  { %p247_p3 = scmp.ne.s32.totalorder %s24_s16, %s246_s26  ;;  %p252_p5 = scmp.lt.s32.totalorder %s246_s26, %s246_s26 }
   0xe   :  { %p253_p6 = por %p252_p5, %p251_p4 }
  0x10   :  { %p254_p7 = pnand %p253_p6, %p247_p3 }
  0x12   :  { %257 = shalt.err (!%p254_p7)
}
  0x13   :  { %26 = dma.hbm_to_vmem [thread:$0]  %s431_s0, 64, %s24_s16, [#allocation3]  }
  0x14   :  { %s258_s5 = scalar_lea.hbm %s432_s1, 256 }
  0x15   :  { %p259_p8 = scmp.ne.s32.totalorder %s432_s1, %s258_s5  ;;  %p262_p9 = scmp.lt.u32.totalorder %s258_s5, %s432_s1 }
  0x17   :  { %p264_p10 = pnand %p262_p9, %p259_p8 }
  0x19   :  { %267 = shalt.err (!%p264_p10)
}
  0x1a   :  { %s268_s10 = scalar_lea.vmem %s365_s18, 256  ;;  %p273_p12 = scmp.lt.s32.totalorder %s365_s18, %s365_s18 }
  0x1b   :  { %p269_p11 = scmp.ne.s32.totalorder %s365_s18, %s268_s10  ;;  %p274_p13 = scmp.lt.s32.totalorder %s268_s10, %s268_s10 }
  0x1d   :  { %p275_p0 = por %p274_p13, %p273_p12 }
  0x1f   :  { %p276_p1 = pnand %p275_p0, %p269_p11 }
  0x21   :  { %279 = shalt.err (!%p276_p1)
}
  0x22   :  { %s334_s0 = smov 64   ;;  %s335_s11 = smov 4  }
  0x23   :  { %38 = dma.hbm_to_vmem [thread:$0]  %s432_s1, 256, %s365_s18, [#allocation6], %s334_s0, %s334_s0, %s335_s11  }
  0x24   :  { %324 = dma.done.wait [#allocation3], 64  }
  0x25   :  { %325 = vsyncadd [#allocation3], 4294967232 }
  0x26   :  { %326 = dma.done.wait [#allocation6], 256  }
  0x27   :  { %327 = vsyncadd [#allocation6], 4294967040  ;;  %v336_v0 = vmov 0.0   ;;  %vm337_vm0 = vmmov 0   ;;  %v234_v1 = vld [vmem:[#allocation5] sm:$0xff]   ;;  %v235_v2 = vld [vmem:[#allocation5 + $0x8] sm:$0xff]  }
  0x28   :  { %218 = vmatprep.subr.bf16.mxu0 %v336_v0  ;;  %53 = vst [vmem:[#allocation7] sm:$0x1] %v336_v0  ;;  %54 = vst [vmem:[#allocation8] sm:$0x1] %v336_v0  ;;  %222 = vmatprep.mubr.msk.bf16.mxu0 %vm337_vm0, %v336_v0  ;;  %v55_v3 = vld [vmem:[#allocation2] sm:$0xf] }
  0x29   :  { %219 = vmatpush3.bf16.msra.mxu0 %v234_v1  ;;  %vm79_vm1 = vcmask 261120   ;;  %v211_v4 = vld [vmem:[%s433_s2] ss:$0 sm:$0xff]  ;;  %s338_s15 = smov [#allocation7]   ;;  %s339_s2 = smov [#allocation8]  }
  0x2a   :  { %220 = vmatprep.subr.bf16.mxu0 %v336_v0  ;;  %s187_s16 = sshll.u32 %s338_s15, 4  ;;  %s197_s17 = sshll.u32 %s339_s2, 4  ;;  %s188_s16 = int_to_ptr.vmem [resolvable:$true] %s187_s16  ;;  %s399_s17 = int_to_ptr.vmem [resolvable:$true] %s197_s17 }
  0x2b   :  { %s280_s18 = scalar_lea.vmem %s188_s16, 16  ;;  %s284_s19 = scalar_lea.vmem %s188_s16, 32 }
  0x2c   :  { %p281_p2 = scmp.ne.s32.totalorder %s188_s16, %s280_s18  ;;  %p285_p3 = scmp.lt.s32.totalorder %s188_s16, %s188_s16 }
  0x2d   :  { %221 = vmatpush3.bf16.msra.mxu0 %v235_v2  ;;  %p286_p4 = scmp.lt.s32.totalorder %s284_s19, %s280_s18 }
  0x2f   :  { %v131_v21 = vld [vmem:[#allocation7] sm:$0x1]  ;;  %v140_v24 = vld [vmem:[#allocation8] sm:$0x1]  ;;  %p287_p5 = por %p286_p4, %p285_p3 }
  0x30   :  { %223 = vmatmul.mubr.msk.bf16.vlgmr.msra.gmra.mrb[0].mxu0 %vm79_vm1, %v55_v3 }
  0x31   :  { %p288_p6 = pnand %p287_p5, %p281_p2 }
 0x103   :  { %v117_v5 = vpop.f32.mrb[0].mxu0 }
 0x104   :  { %v118_v6 = vadd.f32 %v211_v4, %v117_v5  ;;  %v224_v7 = vpop.f32.mrb[1].mxu0 }
 0x105   :  { %v120_v8 = vpop.f32.mrb[2].mxu0 }
 0x106   :  { %v123_v9 = vmax.f32 %v118_v6, 0.0  ;;  %v225_v10 = vpop.f32.mrb[3].mxu0 }
 0x108   :  { %v132_v11 = vrot.slane %v123_v9, 4  ;;  %v141_v12 = vmul.f32 %v123_v9, %v123_v9 }
 0x10a   :  { %v133_v13 = vadd.f32 %v132_v11, %v123_v9  ;;  %v142_v14 = vrot.slane %v141_v12, 4 }
 0x10c   :  { %v134_v15 = vrot.slane %v133_v13, 2  ;;  %v143_v16 = vadd.f32 %v142_v14, %v141_v12 }
 0x10e   :  { %v135_v17 = vadd.f32 %v134_v15, %v133_v13  ;;  %v144_v18 = vrot.slane %v143_v16, 2 }
 0x110   :  { %v136_v19 = vrot.slane %v135_v17, 1  ;;  %v145_v20 = vadd.f32 %v144_v18, %v143_v16 }
 0x112   :  { %v137_v22 = vadd.f32 %v136_v19, %v135_v17  ;;  %v146_v23 = vrot.slane %v145_v20, 1 }
 0x114   :  { %v138_v25 = vadd.f32 %v137_v22, %v131_v21  ;;  %v147_v26 = vadd.f32 %v146_v23, %v145_v20 }
 0x116   :  { %139 = vst [vmem:[#allocation7] sm:$0x1] %v138_v25  ;;  %v148_v27 = vadd.f32 %v147_v26, %v140_v24 }
 0x117   :  { %291 = shalt.err (!%p288_p6)
}
 0x118   :  { %s292_s22 = scalar_lea.hbm %s434_s3, 16 }
 0x119   :  { %p293_p7 = scmp.ne.s32.totalorder %s434_s3, %s292_s22  ;;  %p296_p8 = scmp.lt.u32.totalorder %s292_s22, %s434_s3 }
 0x11b   :  { %p298_p9 = pnand %p296_p8, %p293_p7 }
 0x11d   :  { %301 = shalt.err (!%p298_p9)
}
 0x11e   :  { %190 = dma.vmem_to_hbm [thread:$0]  %s188_s16, 16, %s434_s3, [#allocation4]   ;;  %149 = vst [vmem:[#allocation8] sm:$0x1] %v148_v27 }
 0x11f   :  { %s302_s29 = scalar_lea.vmem %s399_s17, 16  ;;  %s306_s30 = scalar_lea.vmem %s399_s17, 32 }
 0x120   :  { %p303_p10 = scmp.ne.s32.totalorder %s399_s17, %s302_s29  ;;  %p307_p11 = scmp.lt.s32.totalorder %s399_s17, %s399_s17 }
 0x121   :  { %p308_p12 = scmp.lt.s32.totalorder %s306_s30, %s302_s29 }
 0x123   :  { %p309_p13 = por %p308_p12, %p307_p11 }
 0x125   :  { %p310_p0 = pnand %p309_p13, %p303_p10 }
 0x127   :  { %313 = shalt.err (!%p310_p0)
}
 0x128   :  { %s314_s7 = scalar_lea.hbm %s435_s4, 16 }
 0x129   :  { %p315_p1 = scmp.ne.s32.totalorder %s435_s4, %s314_s7  ;;  %p318_p2 = scmp.lt.u32.totalorder %s314_s7, %s435_s4 }
 0x12b   :  { %p320_p3 = pnand %p318_p2, %p315_p1 }
 0x12d   :  { %323 = shalt.err (!%p320_p3)
}
 0x12e   :  { %200 = dma.vmem_to_hbm [thread:$0]  %s399_s17, 16, %s435_s4, [#allocation9]  }
 0x12f   :  { %328 = dma.done.wait [#allocation4], 16  }
 0x130   :  { %329 = vsyncadd [#allocation4], 4294967280 }
 0x131   :  { %330 = dma.done.wait [#allocation9], 16  }
 0x132   :  { %331 = vsyncadd [#allocation9], 4294967280 }
 0x133   :  { %207 = vsyncpa [#allocation3], 1 }
 0x134   :  { %208 = vsyncpa [#allocation6], 1 }
 0x135   :  { %209 = vsyncpa [#allocation4], 1 }
 0x136   :  { %210 = vsyncpa [#allocation9], 1 }

</bundles_post_ra>
